<compile_context>
chip_gen: v7x
topology: tpu7x:2x2x1
jax: 0.10.0
libtpu: 0.0.40
codegen_flags: <defaults>
</compile_context>

<pallas_src>
import jax
import jax.numpy as jnp
from jax.experimental import pallas as pl
from jax.experimental.pallas import tpu as pltpu


# ----------------------------------------------------------------------------
# Fused residual-block kernel factory
# ----------------------------------------------------------------------------
def _make_block_kernel(B_t, L, C, k, d, is_mp, OFF, mm_dtype):
    """B_t: batch rows per grid step.  OFF: sublane-aligned offset (multiple of
    8, >= max causal pad) of the activation inside the zero-padded scratch."""

    def causal_conv(pad_ref, w_ref, b_ref, dil):
        # pad_ref: (B_t, OFF+L, C) f32 scratch, activation at [:, OFF:, :],
        # zeros in [:, :OFF, :].  w_ref: (k*C, C) host-reshaped.  b_ref: (1, C).
        p = (k - 1) * dil
        acc = b_ref[...].astype(jnp.float32)                    # (1,C) -> bcast
        for j in range(k):                                       # static unroll
            s = OFF - p + j * dil                                # tap offset
            tap = pad_ref[:, s:s + L, :].reshape(B_t * L, C)     # x[t-(k-1-j)d]
            acc = acc + jnp.dot(tap.astype(mm_dtype),
                                w_ref[j * C:(j + 1) * C, :],
                                preferred_element_type=jnp.float32)
        return acc                                               # (B_t*L, C) f32

    def ln_relu(v, w_ref, b_ref):
        # LayerNorm over channels (eps matches the module: 1e-8) + ReLU.
        mu = jnp.mean(v, axis=-1, keepdims=True)
        ex2 = jnp.mean(v * v, axis=-1, keepdims=True)
        var = jnp.maximum(ex2 - mu * mu, 0.0)
        y = (v - mu) * jax.lax.rsqrt(var + 1e-8) * w_ref[...] + b_ref[...]
        return jnp.maximum(y, 0.0)

    def kernel(*refs):
        if is_mp:
            (x_ref, c1w, c1b, ln1w, ln1b,
             mp1w, mp1b, mp2w, mp2b, o_ref, pad_ref) = refs
        else:
            (x_ref, c1w, c1b, c2w, c2b,
             ln1w, ln1b, ln2w, ln2b, o_ref, pad_ref) = refs

        x = x_ref[...].astype(jnp.float32)                       # (B_t, L, C)

        if OFF > 0:                                              # causal left pad
            pad_ref[:, :OFF, :] = jnp.zeros((B_t, OFF, C), jnp.float32)
        pad_ref[:, OFF:OFF + L, :] = x

        out = ln_relu(causal_conv(pad_ref, c1w, c1b, d), ln1w, ln1b)

        if is_mp:
            # Reference forward overwrites the conv2/ln2 result with mp(out),
            # so that branch is dead and skipped entirely.
            h = jnp.dot(out.astype(mm_dtype), mp1w[...],
                        preferred_element_type=jnp.float32) + mp1b[...]
            h = jnp.maximum(h, 0.01 * h)                         # leaky_relu(.01)
            out2 = jnp.dot(h.astype(mm_dtype), mp2w[...],
                           preferred_element_type=jnp.float32) + mp2b[...]
        else:
            pad_ref[:, OFF:OFF + L, :] = out.reshape(B_t, L, C)  # pad rows stay 0
            out2 = ln_relu(causal_conv(pad_ref, c2w, c2b, 2 * d), ln2w, ln2b)

        o_ref[...] = (out2.reshape(B_t, L, C) + x).astype(o_ref.dtype)

    return kernel


# ----------------------------------------------------------------------------
# Wrapper
# ----------------------------------------------------------------------------
def residual_block_b_mp_serial(x, p, *, kernel_size, dilation, is_mp,
                               batch_tile=None, use_bf16_matmul=False):
    B, L, C = x.shape
    k, d = kernel_size, dilation
    H = p["mp1w"].shape[1]
    Hp = ((max(H, 1) + 127) // 128) * 128            # lane-dense bottleneck width

    # Default to a single grid step: the ~0.35 us per-step pipeline overhead
    # dominates the tiny per-step work at these shapes, and v5e/v6e have one
    # TensorCore anyway.  Only split 2-way (v7x's 2 TCs) when each core gets
    # enough rows to amortize an extra step.
    if batch_tile is None:
        batch_tile = B
        if B % 2 == 0 and (B // 2) * L >= 2048:
            batch_tile = B // 2
    assert B % batch_tile == 0

    mm_dtype = jnp.bfloat16 if use_bf16_matmul else jnp.float32
    f32 = jnp.float32

    # ---- one-time host-side parameter prep (removes per-step relayouts) ----
    c1w = p["c1w"].reshape(k * C, C).astype(mm_dtype)            # (k,C,C)->(kC,C)
    c1b = p["c1b"].astype(f32)
    if is_mp:
        mp1w = jnp.zeros((C, Hp), mm_dtype).at[:, :H].set(p["mp1w"].astype(mm_dtype))
        mp1b = jnp.zeros((1, Hp), f32).at[:, :H].set(p["mp1b"].astype(f32))
        mp2w = jnp.zeros((Hp, C), mm_dtype).at[:H, :].set(p["mp2w"].astype(mm_dtype))
        operands = (x, c1w, c1b, p["ln1w"].astype(f32), p["ln1b"].astype(f32),
                    mp1w, mp1b, mp2w, p["mp2b"].astype(f32))
    else:
        c2w = p["c2w"].reshape(k * C, C).astype(mm_dtype)
        operands = (x, c1w, c1b, c2w, p["c2b"].astype(f32),
                    p["ln1w"].astype(f32), p["ln1b"].astype(f32),
                    p["ln2w"].astype(f32), p["ln2b"].astype(f32))

    max_dil = d if is_mp else 2 * d
    pad = (k - 1) * max_dil
    OFF = ((pad + 7) // 8) * 8                       # sublane-aligned x offset

    kern = _make_block_kernel(batch_tile, L, C, k, d, is_mp, OFF, mm_dtype)

    def const_spec(shape):
        nd = len(shape)
        return pl.BlockSpec(shape, lambda b, _n=nd: (0,) * _n)

    in_specs = ([pl.BlockSpec((batch_tile, L, C), lambda b: (b, 0, 0))]
                + [const_spec(a.shape) for a in operands[1:]])

    return pl.pallas_call(
        kern,
        out_shape=jax.ShapeDtypeStruct((B, L, C), x.dtype),
        grid_spec=pltpu.PrefetchScalarGridSpec(
            num_scalar_prefetch=0,
            grid=(B // batch_tile,),
            in_specs=in_specs,
            out_specs=pl.BlockSpec((batch_tile, L, C), lambda b: (b, 0, 0)),
            scratch_shapes=[pltpu.VMEM((batch_tile, OFF + L, C), jnp.float32)]),
        compiler_params=pltpu.CompilerParams(
            dimension_semantics=("parallel",)),
    )(*operands)


# ----------------------------------------------------------------------------
# Deterministic synthetic parameters (exactly 12 keys)
# ----------------------------------------------------------------------------
def init_params(key, *, channel, kernel_size):
    C, H, k = channel, channel // 4, kernel_size
    ks = jax.random.split(key, 12)

    def n(kk, shape, s):
        return s * jax.random.normal(kk, shape, jnp.float32)

    return dict(
        c1w=n(ks[0], (k, C, C), 0.15),      c1b=n(ks[1], (1, C), 0.02),
        c2w=n(ks[2], (k, C, C), 0.15),      c2b=n(ks[3], (1, C), 0.02),
        ln1w=1.0 + n(ks[4], (1, C), 0.05),  ln1b=n(ks[5], (1, C), 0.02),
        ln2w=1.0 + n(ks[6], (1, C), 0.05),  ln2b=n(ks[7], (1, C), 0.02),
        mp1w=n(ks[8], (C, H), 0.2),         mp1b=n(ks[9], (1, H), 0.02),
        mp2w=n(ks[10], (H, C), 0.2),        mp2b=n(ks[11], (1, C), 0.02),
    )


# ----------------------------------------------------------------------------
# Pure-JAX reference (mirrors the PyTorch forward) for validation
# ----------------------------------------------------------------------------
def reference_block(x, p, *, kernel_size, dilation, is_mp):
    hi = jax.lax.Precision.HIGHEST
    k, L = kernel_size, x.shape[1]

    def conv(inp, w, b, dil):
        pad = (k - 1) * dil
        xp = jnp.pad(inp, ((0, 0), (pad, 0), (0, 0)))
        out = b
        for j in range(k):
            out = out + jnp.einsum("blc,co->blo",
                                   xp[:, j * dil:j * dil + L, :], w[j],
                                   precision=hi)
        return out

    def ln(v, w, b):
        mu = jnp.mean(v, -1, keepdims=True)
        vc = v - mu
        var = jnp.mean(vc * vc, -1, keepdims=True)
        return vc * jax.lax.rsqrt(var + 1e-8) * w + b

    out = jax.nn.relu(ln(conv(x, p["c1w"], p["c1b"], dilation),
                         p["ln1w"], p["ln1b"]))
    if is_mp:
        h = jnp.einsum("blc,ch->blh", out, p["mp1w"], precision=hi) + p["mp1b"]
        h = jnp.where(h > 0, h, 0.01 * h)
        out2 = jnp.einsum("blh,hc->blc", h, p["mp2w"], precision=hi) + p["mp2b"]
    else:
        out2 = jax.nn.relu(ln(conv(out, p["c2w"], p["c2b"], 2 * dilation),
                              p["ln2w"], p["ln2b"]))
    return out2 + x


if __name__ == "__main__":
    # small config consistent with the module: residual_channels=32, seq=16
    B, L, C = 4, 16, 32
    kernel_size, dilation = 3, 1

    key = jax.random.PRNGKey(0)
    pkey, xkey = jax.random.split(key)
    params = init_params(pkey, channel=C, kernel_size=kernel_size)
    x = jax.random.normal(xkey, (B, L, C), jnp.float32)

    for is_mp in (True, False):
        y_ref = reference_block(x, params, kernel_size=kernel_size,
                                dilation=dilation, is_mp=is_mp)
        for use_bf16, tol in ((False, 2e-3), (True, 1.5e-1)):
            y = residual_block_b_mp_serial(
                x, params, kernel_size=kernel_size, dilation=dilation,
                is_mp=is_mp, use_bf16_matmul=use_bf16)
            y = jax.block_until_ready(y)
            assert y.shape == (B, L, C), y.shape
            assert y.dtype == jnp.float32
            assert bool(jnp.all(jnp.isfinite(y)))
            err = float(jnp.max(jnp.abs(y - y_ref)))
            assert err < tol, f"is_mp={is_mp} bf16={use_bf16}: max abs err {err}"

    print("KERNEL_OK")
</pallas_src>

<mosaic_0001>
module attributes {stable_mosaic.version = 11 : i64} {
  func.func @kernel(%arg0: i32, %arg1: memref<4x16x32xf32, #tpu.memory_space<vmem>>, %arg2: memref<96x32xf32, #tpu.memory_space<vmem>>, %arg3: memref<1x32xf32, #tpu.memory_space<vmem>>, %arg4: memref<1x32xf32, #tpu.memory_space<vmem>>, %arg5: memref<1x32xf32, #tpu.memory_space<vmem>>, %arg6: memref<32x128xf32, #tpu.memory_space<vmem>>, %arg7: memref<1x128xf32, #tpu.memory_space<vmem>>, %arg8: memref<128x32xf32, #tpu.memory_space<vmem>>, %arg9: memref<1x32xf32, #tpu.memory_space<vmem>>, %arg10: memref<4x16x32xf32, #tpu.memory_space<vmem>>, %arg11: memref<4x24x32xf32, #tpu.memory_space<vmem>>) attributes {dimension_semantics = [#tpu.dimension_semantics<parallel>], iteration_bounds = array<i64: 1>, scalar_prefetch = 0 : i64, scratch_operands = 1 : i64, tpu.core_type = #tpu.core_type<tc>, window_params = [{transform_indices = @transform_0, window_bounds = array<i64: 4, 16, 32>}, {pipeline_mode = #tpu.pipeline_mode<synchronous>, transform_indices = @transform_1, window_bounds = array<i64: 96, 32>}, {pipeline_mode = #tpu.pipeline_mode<synchronous>, transform_indices = @transform_2, window_bounds = array<i64: 1, 32>}, {pipeline_mode = #tpu.pipeline_mode<synchronous>, transform_indices = @transform_3, window_bounds = array<i64: 1, 32>}, {pipeline_mode = #tpu.pipeline_mode<synchronous>, transform_indices = @transform_4, window_bounds = array<i64: 1, 32>}, {pipeline_mode = #tpu.pipeline_mode<synchronous>, transform_indices = @transform_5, window_bounds = array<i64: 32, 128>}, {pipeline_mode = #tpu.pipeline_mode<synchronous>, transform_indices = @transform_6, window_bounds = array<i64: 1, 128>}, {pipeline_mode = #tpu.pipeline_mode<synchronous>, transform_indices = @transform_7, window_bounds = array<i64: 128, 32>}, {pipeline_mode = #tpu.pipeline_mode<synchronous>, transform_indices = @transform_8, window_bounds = array<i64: 1, 32>}, {transform_indices = @transform_9, window_bounds = array<i64: 4, 16, 32>}]} {
    %c0 = arith.constant 0 : index
    %c0_0 = arith.constant 0 : index
    %c0_1 = arith.constant 0 : index
    %0 = vector.load %arg1[%c0, %c0_0, %c0_1] : memref<4x16x32xf32, #tpu.memory_space<vmem>>, vector<4x16x32xf32>
    %cst = arith.constant 0.000000e+00 : f32
    %1 = vector.broadcast %cst : f32 to vector<4x8x32xf32>
    %c0_2 = arith.constant 0 : index
    %c0_3 = arith.constant 0 : index
    %c0_4 = arith.constant 0 : index
    %2 = vector.load %arg11[%c0_2, %c0_3, %c0_4] : memref<4x24x32xf32, #tpu.memory_space<vmem>>, vector<4x8x32xf32>
    tpu.vector_store %arg11[%c0_2, %c0_3, %c0_4], %1 {strides = array<i32>} : memref<4x24x32xf32, #tpu.memory_space<vmem>>, vector<4x8x32xf32>,
    %c0_5 = arith.constant 0 : index
    %c8 = arith.constant 8 : index
    %c0_6 = arith.constant 0 : index
    %3 = vector.load %arg11[%c0_5, %c8, %c0_6] : memref<4x24x32xf32, #tpu.memory_space<vmem>>, vector<4x16x32xf32>
    tpu.vector_store %arg11[%c0_5, %c8, %c0_6], %0 {strides = array<i32>} : memref<4x24x32xf32, #tpu.memory_space<vmem>>, vector<4x16x32xf32>,
    %c0_7 = arith.constant 0 : index
    %c0_8 = arith.constant 0 : index
    %4 = vector.load %arg3[%c0_7, %c0_8] : memref<1x32xf32, #tpu.memory_space<vmem>>, vector<1x32xf32>
    %c0_9 = arith.constant 0 : index
    %c6 = arith.constant 6 : index
    %c0_10 = arith.constant 0 : index
    %5 = vector.load %arg11[%c0_9, %c6, %c0_10] : memref<4x24x32xf32, #tpu.memory_space<vmem>>, vector<4x16x32xf32>
    %6 = vector.shape_cast %5 : vector<4x16x32xf32> to vector<64x32xf32>
    %c0_11 = arith.constant 0 : index
    %c0_12 = arith.constant 0 : index
    %7 = vector.load %arg2[%c0_11, %c0_12] : memref<96x32xf32, #tpu.memory_space<vmem>>, vector<32x32xf32>
    %cst_13 = arith.constant dense<0.000000e+00> : vector<64x32xf32>
    %8 = tpu.matmul %6, %7, %cst_13 {dimension_numbers = #tpu.dot_dimension_numbers<[1], [0], [0], [1], [0, 0, 1, 1], [], []>} : vector<64x32xf32>, vector<32x32xf32>, vector<64x32xf32> -> vector<64x32xf32>
    %9 = vector.broadcast %4 : vector<1x32xf32> to vector<64x32xf32>
    %10 = arith.addf %9, %8 : vector<64x32xf32>
    %c0_14 = arith.constant 0 : index
    %c7 = arith.constant 7 : index
    %c0_15 = arith.constant 0 : index
    %11 = vector.load %arg11[%c0_14, %c7, %c0_15] : memref<4x24x32xf32, #tpu.memory_space<vmem>>, vector<4x16x32xf32>
    %12 = vector.shape_cast %11 : vector<4x16x32xf32> to vector<64x32xf32>
    %c32 = arith.constant 32 : index
    %c0_16 = arith.constant 0 : index
    %13 = vector.load %arg2[%c32, %c0_16] : memref<96x32xf32, #tpu.memory_space<vmem>>, vector<32x32xf32>
    %cst_17 = arith.constant dense<0.000000e+00> : vector<64x32xf32>
    %14 = tpu.matmul %12, %13, %cst_17 {dimension_numbers = #tpu.dot_dimension_numbers<[1], [0], [0], [1], [0, 0, 1, 1], [], []>} : vector<64x32xf32>, vector<32x32xf32>, vector<64x32xf32> -> vector<64x32xf32>
    %15 = arith.addf %10, %14 : vector<64x32xf32>
    %c0_18 = arith.constant 0 : index
    %c8_19 = arith.constant 8 : index
    %c0_20 = arith.constant 0 : index
    %16 = vector.load %arg11[%c0_18, %c8_19, %c0_20] : memref<4x24x32xf32, #tpu.memory_space<vmem>>, vector<4x16x32xf32>
    %17 = vector.shape_cast %16 : vector<4x16x32xf32> to vector<64x32xf32>
    %c64 = arith.constant 64 : index
    %c0_21 = arith.constant 0 : index
    %18 = vector.load %arg2[%c64, %c0_21] : memref<96x32xf32, #tpu.memory_space<vmem>>, vector<32x32xf32>
    %cst_22 = arith.constant dense<0.000000e+00> : vector<64x32xf32>
    %19 = tpu.matmul %17, %18, %cst_22 {dimension_numbers = #tpu.dot_dimension_numbers<[1], [0], [0], [1], [0, 0, 1, 1], [], []>} : vector<64x32xf32>, vector<32x32xf32>, vector<64x32xf32> -> vector<64x32xf32>
    %20 = arith.addf %15, %19 : vector<64x32xf32>
    %cst_23 = arith.constant dense<0.000000e+00> : vector<64xf32>
    %21 = vector.multi_reduction <add>, %20, %cst_23 [1] : vector<64x32xf32> to vector<64xf32>
    %22 = vector.shape_cast %21 : vector<64xf32> to vector<64x1xf32>
    %cst_24 = arith.constant 3.200000e+01 : f32
    %23 = vector.broadcast %cst_24 : f32 to vector<64x1xf32>
    %24 = arith.divf %22, %23 : vector<64x1xf32>
    %25 = arith.mulf %20, %20 : vector<64x32xf32>
    %cst_25 = arith.constant dense<0.000000e+00> : vector<64xf32>
    %26 = vector.multi_reduction <add>, %25, %cst_25 [1] : vector<64x32xf32> to vector<64xf32>
    %27 = vector.shape_cast %26 : vector<64xf32> to vector<64x1xf32>
    %cst_26 = arith.constant 3.200000e+01 : f32
    %28 = vector.broadcast %cst_26 : f32 to vector<64x1xf32>
    %29 = arith.divf %27, %28 : vector<64x1xf32>
    %30 = arith.mulf %24, %24 : vector<64x1xf32>
    %31 = arith.subf %29, %30 : vector<64x1xf32>
    %cst_27 = arith.constant 0.000000e+00 : f32
    %32 = vector.broadcast %cst_27 : f32 to vector<64x1xf32>
    %33 = arith.maximumf %31, %32 : vector<64x1xf32>
    %34 = vector.broadcast %24 : vector<64x1xf32> to vector<64x32xf32>
    %35 = arith.subf %20, %34 : vector<64x32xf32>
    %cst_28 = arith.constant 9.99999993E-9 : f32
    %36 = vector.broadcast %cst_28 : f32 to vector<64x1xf32>
    %37 = arith.addf %33, %36 : vector<64x1xf32>
    %38 = math.rsqrt %37 : vector<64x1xf32>
    %39 = vector.broadcast %38 : vector<64x1xf32> to vector<64x32xf32>
    %40 = arith.mulf %35, %39 : vector<64x32xf32>
    %c0_29 = arith.constant 0 : index
    %c0_30 = arith.constant 0 : index
    %41 = vector.load %arg4[%c0_29, %c0_30] : memref<1x32xf32, #tpu.memory_space<vmem>>, vector<1x32xf32>
    %42 = vector.broadcast %41 : vector<1x32xf32> to vector<64x32xf32>
    %43 = arith.mulf %40, %42 : vector<64x32xf32>
    %c0_31 = arith.constant 0 : index
    %c0_32 = arith.constant 0 : index
    %44 = vector.load %arg5[%c0_31, %c0_32] : memref<1x32xf32, #tpu.memory_space<vmem>>, vector<1x32xf32>
    %45 = vector.broadcast %44 : vector<1x32xf32> to vector<64x32xf32>
    %46 = arith.addf %43, %45 : vector<64x32xf32>
    %cst_33 = arith.constant 0.000000e+00 : f32
    %47 = vector.broadcast %cst_33 : f32 to vector<64x32xf32>
    %48 = arith.maximumf %46, %47 : vector<64x32xf32>
    %c0_34 = arith.constant 0 : index
    %c0_35 = arith.constant 0 : index
    %49 = vector.load %arg6[%c0_34, %c0_35] : memref<32x128xf32, #tpu.memory_space<vmem>>, vector<32x128xf32>
    %cst_36 = arith.constant dense<0.000000e+00> : vector<64x128xf32>
    %50 = tpu.matmul %48, %49, %cst_36 {dimension_numbers = #tpu.dot_dimension_numbers<[1], [0], [0], [1], [0, 0, 1, 1], [], []>} : vector<64x32xf32>, vector<32x128xf32>, vector<64x128xf32> -> vector<64x128xf32>
    %c0_37 = arith.constant 0 : index
    %c0_38 = arith.constant 0 : index
    %51 = vector.load %arg7[%c0_37, %c0_38] : memref<1x128xf32, #tpu.memory_space<vmem>>, vector<1x128xf32>
    %52 = vector.broadcast %51 : vector<1x128xf32> to vector<64x128xf32>
    %53 = arith.addf %50, %52 : vector<64x128xf32>
    %cst_39 = arith.constant 0.00999999977 : f32
    %54 = vector.broadcast %cst_39 : f32 to vector<64x128xf32>
    %55 = arith.mulf %54, %53 : vector<64x128xf32>
    %56 = arith.maximumf %53, %55 : vector<64x128xf32>
    %c0_40 = arith.constant 0 : index
    %c0_41 = arith.constant 0 : index
    %57 = vector.load %arg8[%c0_40, %c0_41] : memref<128x32xf32, #tpu.memory_space<vmem>>, vector<128x32xf32>
    %cst_42 = arith.constant dense<0.000000e+00> : vector<64x32xf32>
    %58 = tpu.matmul %56, %57, %cst_42 {dimension_numbers = #tpu.dot_dimension_numbers<[1], [0], [0], [1], [0, 0, 1, 1], [], []>} : vector<64x128xf32>, vector<128x32xf32>, vector<64x32xf32> -> vector<64x32xf32>
    %c0_43 = arith.constant 0 : index
    %c0_44 = arith.constant 0 : index
    %59 = vector.load %arg9[%c0_43, %c0_44] : memref<1x32xf32, #tpu.memory_space<vmem>>, vector<1x32xf32>
    %60 = vector.broadcast %59 : vector<1x32xf32> to vector<64x32xf32>
    %61 = arith.addf %58, %60 : vector<64x32xf32>
    %62 = vector.shape_cast %61 : vector<64x32xf32> to vector<4x16x32xf32>
    %63 = arith.addf %62, %0 : vector<4x16x32xf32>
    %c0_45 = arith.constant 0 : index
    %c0_46 = arith.constant 0 : index
    %c0_47 = arith.constant 0 : index
    %64 = vector.load %arg10[%c0_45, %c0_46, %c0_47] : memref<4x16x32xf32, #tpu.memory_space<vmem>>, vector<4x16x32xf32>
    tpu.vector_store %arg10[%c0_45, %c0_46, %c0_47], %63 {strides = array<i32>} : memref<4x16x32xf32, #tpu.memory_space<vmem>>, vector<4x16x32xf32>,
    return
  }
  func.func @transform_0(%arg0: i32) -> (i32, i32, i32) {
    %c0_i32 = arith.constant 0 : i32
    %c0_i32_0 = arith.constant 0 : i32
    %c0_i32_1 = arith.constant 0 : i32
    return %arg0, %c0_i32, %c0_i32_0 : i32, i32, i32
  }
  func.func @transform_1(%arg0: i32) -> (i32, i32) {
    %c0_i32 = arith.constant 0 : i32
    %c0_i32_0 = arith.constant 0 : i32
    %c0_i32_1 = arith.constant 0 : i32
    return %c0_i32, %c0_i32_0 : i32, i32
  }
  func.func @transform_2(%arg0: i32) -> (i32, i32) {
    %c0_i32 = arith.constant 0 : i32
    %c0_i32_0 = arith.constant 0 : i32
    %c0_i32_1 = arith.constant 0 : i32
    return %c0_i32, %c0_i32_0 : i32, i32
  }
  func.func @transform_3(%arg0: i32) -> (i32, i32) {
    %c0_i32 = arith.constant 0 : i32
    %c0_i32_0 = arith.constant 0 : i32
    %c0_i32_1 = arith.constant 0 : i32
    return %c0_i32, %c0_i32_0 : i32, i32
  }
  func.func @transform_4(%arg0: i32) -> (i32, i32) {
    %c0_i32 = arith.constant 0 : i32
    %c0_i32_0 = arith.constant 0 : i32
    %c0_i32_1 = arith.constant 0 : i32
    return %c0_i32, %c0_i32_0 : i32, i32
  }
  func.func @transform_5(%arg0: i32) -> (i32, i32) {
    %c0_i32 = arith.constant 0 : i32
    %c0_i32_0 = arith.constant 0 : i32
    %c0_i32_1 = arith.constant 0 : i32
    return %c0_i32, %c0_i32_0 : i32, i32
  }
  func.func @transform_6(%arg0: i32) -> (i32, i32) {
    %c0_i32 = arith.constant 0 : i32
    %c0_i32_0 = arith.constant 0 : i32
    %c0_i32_1 = arith.constant 0 : i32
    return %c0_i32, %c0_i32_0 : i32, i32
  }
  func.func @transform_7(%arg0: i32) -> (i32, i32) {
    %c0_i32 = arith.constant 0 : i32
    %c0_i32_0 = arith.constant 0 : i32
    %c0_i32_1 = arith.constant 0 : i32
    return %c0_i32, %c0_i32_0 : i32, i32
  }
  func.func @transform_8(%arg0: i32) -> (i32, i32) {
    %c0_i32 = arith.constant 0 : i32
    %c0_i32_0 = arith.constant 0 : i32
    %c0_i32_1 = arith.constant 0 : i32
    return %c0_i32, %c0_i32_0 : i32, i32
  }
  func.func @transform_9(%arg0: i32) -> (i32, i32, i32) {
    %c0_i32 = arith.constant 0 : i32
    %c0_i32_0 = arith.constant 0 : i32
    %c0_i32_1 = arith.constant 0 : i32
    return %arg0, %c0_i32, %c0_i32_0 : i32, i32, i32
  }
}

</mosaic_0001>

<bundles_post_ra>
// kernel: tpu_custom_call.1
= control target key start
LH: loop header
LB: loop body
LE: loop exit
PB: predicated region body
PF: predicated region fallthrough
CT: control target
= control target key end

     0   :  { %vm41_vm0 = vcmask 261120   ;;  %v1356_v6 = vmov 0.0   ;;  %s1759_s0 = inlined_call_operand.vmem [shape: f32[4,16,32], index: 0, kind: input, shape index: {}]   ;;  %s1760_s1 = inlined_call_operand.vmem [shape: f32[96,32], index: 1, kind: input, shape index: {}]   ;;  %s1761_s2 = inlined_call_operand.vmem [shape: f32[1,32], index: 2, kind: input, shape index: {}]   ;;  %s1762_s3 = inlined_call_operand.vmem [shape: f32[1,32], index: 3, kind: input, shape index: {}]   ;;  %s1763_s4 = inlined_call_operand.vmem [shape: f32[1,32], index: 4, kind: input, shape index: {}]   ;;  %s1764_s5 = inlined_call_operand.vmem [shape: f32[32,128], index: 5, kind: input, shape index: {}]   ;;  %s1765_s6 = inlined_call_operand.vmem [shape: f32[1,128], index: 6, kind: input, shape index: {}]   ;;  %s1766_s7 = inlined_call_operand.vmem [shape: f32[128,32], index: 7, kind: input, shape index: {}]   ;;  %s1767_s8 = inlined_call_operand.vmem [shape: f32[1,32], index: 8, kind: input, shape index: {}]   ;;  %s1768_s9 = inlined_call_operand.hbm [shape: f32[4,16,32], index: 9, kind: output, shape index: {}]  }
   0x1   :  { %v63_v0 = vld [vmem:[%s1760_s1] sm:$0xff]  ;;  %v64_v1 = vld [vmem:[%s1760_s1 + $0x8] sm:$0xff]  ;;  %v65_v2 = vld [vmem:[%s1760_s1 + $0x10] sm:$0xff]  ;;  %42 = vst.msk [vmem:[#allocation2] sm:$0xff] %vm41_vm0, %v1356_v6 }
   0x2   :  { %v1224_v3 = vpack.c.bf16 %v64_v1, %v63_v0  ;;  %v66_v4 = vld [vmem:[%s1760_s1 + $0x18] sm:$0xff]  ;;  %v1425_v5 = vld [vmem:[%s1759_s0] sm:$0xff]  ;;  %43 = vst.msk [vmem:[#allocation2 + $0x18] sm:$0xff] %vm41_vm0, %v1356_v6  ;;  %44 = vst.msk [vmem:[#allocation2 + $0x30] sm:$0xff] %vm41_vm0, %v1356_v6 }
   0x3   :  { %45 = vst.msk [vmem:[#allocation2 + $0x48] sm:$0xff] %vm41_vm0, %v1356_v6  ;;  %v1434_v7 = vld [vmem:[%s1759_s0 + $0x8] sm:$0xff]  ;;  %v1228_v8 = vpack.c.bf16 %v66_v4, %v65_v2  ;;  %46 = vst.msk [vmem:[#allocation2 + $0x8] sm:$0xff] %vm41_vm0, %v1425_v5  ;;  %v218_v9 = vld [vmem:[%s1760_s1 + $0x20] sm:$0xff] }
   0x4   :  { %47 = vst.msk [vmem:[#allocation2 + $0x10] sm:$0xff] %vm41_vm0, %v1434_v7  ;;  %v219_v10 = vld [vmem:[%s1760_s1 + $0x28] sm:$0xff]  ;;  %v1449_v11 = vld [vmem:[%s1759_s0 + $0x10] sm:$0xff]  ;;  %1225 = vmatprep.subr.bf16.mxu0 %v1224_v3  ;;  %v1456_v12 = vld [vmem:[%s1759_s0 + $0x18] sm:$0xff] }
   0x5   :  { %48 = vst.msk [vmem:[#allocation2 + $0x20] sm:$0xff] %vm41_vm0, %v1449_v11  ;;  %v1461_v13 = vld [vmem:[%s1759_s0 + $0x20] sm:$0xff]  ;;  %v1466_v14 = vld [vmem:[%s1759_s0 + $0x28] sm:$0xff]  ;;  %1227 = vmatpush3.bf16.msra.mxu0 %v1224_v3  ;;  %49 = vst.msk [vmem:[#allocation2 + $0x28] sm:$0xff] %vm41_vm0, %v1456_v12  ;;  %v1232_v16 = vpack.c.bf16 %v219_v10, %v218_v9 }
   0x6   :  { %50 = vst.msk [vmem:[#allocation2 + $0x38] sm:$0xff] %vm41_vm0, %v1461_v13  ;;  %51 = vst.msk [vmem:[#allocation2 + $0x40] sm:$0xff] %vm41_vm0, %v1466_v14  ;;  %v1477_v15 = vld [vmem:[%s1759_s0 + $0x30] sm:$0xff]  ;;  %1229 = vmatprep.subr.bf16.mxu0 %v1228_v8  ;;  %v1484_v17 = vld [vmem:[%s1759_s0 + $0x38] sm:$0xff] }
   0x7   :  { %52 = vst.msk [vmem:[#allocation2 + $0x50] sm:$0xff] %vm41_vm0, %v1477_v15  ;;  %v220_v18 = vld [vmem:[%s1760_s1 + $0x30] sm:$0xff]  ;;  %v221_v19 = vld [vmem:[%s1760_s1 + $0x38] sm:$0xff]  ;;  %53 = vst.msk [vmem:[#allocation2 + $0x58] sm:$0xff] %vm41_vm0, %v1484_v17 }
   0x8   :  { %14 = vsyncpa [#allocation4], 0  ;;  %v1236_v22 = vpack.c.bf16 %v221_v19, %v220_v18  ;;  %v367_v24 = vld [vmem:[%s1760_s1 + $0x40] sm:$0xff]  ;;  %v368_v25 = vld [vmem:[%s1760_s1 + $0x48] sm:$0xff] }
   0x9   :  { %1231 = vmatpush3.bf16.msra.mxu0 %v1228_v8  ;;  %v1240_v28 = vpack.c.bf16 %v368_v25, %v367_v24  ;;  %v369_v33 = vld [vmem:[%s1760_s1 + $0x50] sm:$0xff]  ;;  %v370_v34 = vld [vmem:[%s1760_s1 + $0x58] sm:$0xff]  ;;  %v999_v51 = vld [vmem:[%s1761_s2] ss:$0 sm:$0xff] }
   0xa   :  { %v55_v20 = vld [vmem:[#allocation2 + $0x6] sm:$0xff]  ;;  %1233 = vmatprep.subr.bf16.mxu0 %v1232_v16  ;;  %v1244_v37 = vpack.c.bf16 %v370_v34, %v369_v33 }
   0xb   :  { %v56_v21 = vld [vmem:[#allocation2 + $0xe] sm:$0xff]  ;;  %1108 = vmatprep.mubr.msk.f32.mxu0 %vm41_vm0, %v55_v20 }
   0xc   :  { %v57_v23 = vld [vmem:[#allocation2 + $0x1e] sm:$0xff]  ;;  %1109 = vmatmul.mubr.msk.f32.vlgmr.msra.gmra.mrb[0].mxu0 %vm41_vm0, %v56_v21  ;;  %v58_v26 = vld [vmem:[#allocation2 + $0x26] sm:$0xff]  ;;  %v211_v35 = vld [vmem:[#allocation2 + $0xf] sm:$0xff] }
   0xd   :  { %1235 = vmatpush3.bf16.msra.mxu0 %v1232_v16  ;;  %1111 = vmatprep.mubr.msk.f32.mxu0 %vm41_vm0, %v57_v23  ;;  %v59_v27 = vld [vmem:[#allocation2 + $0x36] sm:$0xff]  ;;  %v60_v29 = vld [vmem:[#allocation2 + $0x3e] sm:$0xff]  ;;  %v210_v32 = vld [vmem:[#allocation2 + $0x7] sm:$0xff] }
   0xe   :  { %1237 = vmatprep.subr.bf16.mxu0 %v1236_v22  ;;  %v61_v30 = vld [vmem:[#allocation2 + $0x4e] sm:$0xff]  ;;  %v62_v31 = vld [vmem:[#allocation2 + $0x56] sm:$0xff]  ;;  %v212_v36 = vld [vmem:[#allocation2 + $0x1f] sm:$0xff] }
   0xf   :  { %v213_v38 = vld [vmem:[#allocation2 + $0x27] sm:$0xff]  ;;  %v214_v39 = vld [vmem:[#allocation2 + $0x37] sm:$0xff]  ;;  %v215_v40 = vld [vmem:[#allocation2 + $0x3f] sm:$0xff] }
  0x10   :  { %1112 = vmatmul.mubr.msk.f32.gmra.mrb[2].mxu0 %vm41_vm0, %v58_v26  ;;  %v216_v41 = vld [vmem:[#allocation2 + $0x4f] sm:$0xff]  ;;  %v217_v42 = vld [vmem:[#allocation2 + $0x57] sm:$0xff]  ;;  %v361_v45 = vld [vmem:[#allocation2 + $0x20] sm:$0xff] }
  0x11   :  { %1114 = vmatprep.mubr.msk.f32.mxu0 %vm41_vm0, %v59_v27  ;;  %1239 = vmatpush3.bf16.msra.mxu0 %v1236_v22  ;;  %v359_v43 = vld [vmem:[#allocation2 + $0x8] sm:$0xff]  ;;  %v360_v44 = vld [vmem:[#allocation2 + $0x10] sm:$0xff]  ;;  %v363_v47 = vld [vmem:[#allocation2 + $0x38] sm:$0xff] }
  0x12   :  { %1241 = vmatprep.subr.bf16.mxu0 %v1240_v28  ;;  %v362_v46 = vld [vmem:[#allocation2 + $0x28] sm:$0xff]  ;;  %v364_v48 = vld [vmem:[#allocation2 + $0x40] sm:$0xff]  ;;  %v365_v49 = vld [vmem:[#allocation2 + $0x50] sm:$0xff] }
  0x13   :  { %v366_v50 = vld [vmem:[#allocation2 + $0x58] sm:$0xff] }
  0x14   :  { %1115 = vmatmul.mubr.msk.f32.gmra.mrb[4].mxu0 %vm41_vm0, %v60_v29 }
  0x15   :  { %1117 = vmatprep.mubr.msk.f32.mxu0 %vm41_vm0, %v61_v30 }
  0x18   :  { %1118 = vmatmul.mubr.msk.f32.gmra.mrb[6].mxu0 %vm41_vm0, %v62_v31 }
  0x19   :  { %1128 = vmatprep.mubr.msk.f32.mxu0 %vm41_vm0, %v210_v32 }
  0x1c   :  { %1129 = vmatmul.mubr.msk.f32.vlgmr.msra.gmra.mrb[0].mxu0 %vm41_vm0, %v211_v35 }
  0x1d   :  { %1243 = vmatpush3.bf16.msra.mxu0 %v1240_v28  ;;  %1131 = vmatprep.mubr.msk.f32.mxu0 %vm41_vm0, %v212_v36  ;;  %v675_v36 = vld [vmem:[%s1764_s5] sm:$0xff] }
  0x1e   :  { %1245 = vmatprep.subr.bf16.mxu0 %v1244_v37 }
  0x20   :  { %1132 = vmatmul.mubr.msk.f32.gmra.mrb[2].mxu0 %vm41_vm0, %v213_v38 }
  0x21   :  { %1134 = vmatprep.mubr.msk.f32.mxu0 %vm41_vm0, %v214_v39  ;;  %1247 = vmatpush3.bf16.msra.mxu0 %v1244_v37  ;;  %v676_v37 = vld [vmem:[%s1764_s5 + $0x8] sm:$0xff]  ;;  %v677_v39 = vld [vmem:[%s1764_s5 + $0x10] sm:$0xff] }
  0x22   :  { %v1248_v38 = vpack.c.bf16 %v676_v37, %v675_v36 }
  0x24   :  { %1135 = vmatmul.mubr.msk.f32.gmra.mrb[4].mxu0 %vm41_vm0, %v215_v40  ;;  %1249 = vmatprep.subr.bf16.mxu1 %v1248_v38  ;;  %v678_v40 = vld [vmem:[%s1764_s5 + $0x18] sm:$0xff] }
  0x25   :  { %1137 = vmatprep.mubr.msk.f32.mxu0 %vm41_vm0, %v216_v41  ;;  %1251 = vmatpush3.bf16.msra.mxu1 %v1248_v38  ;;  %v1252_v41 = vpack.c.bf16 %v678_v40, %v677_v39  ;;  %v1628_v38 = vld [vmem:[%s1762_s3] ss:$0 sm:$0xff] }
  0x27   :  { %1253 = vmatprep.subr.bf16.mxu1 %v1252_v41 }
  0x28   :  { %1138 = vmatmul.mubr.msk.f32.gmra.mrb[6].mxu0 %vm41_vm0, %v217_v42  ;;  %v831_v42 = vld [vmem:[%s1766_s7] sm:$0xff] }
  0x29   :  { %1148 = vmatprep.mubr.msk.f32.mxu0 %vm41_vm0, %v359_v43  ;;  %1255 = vmatpush3.bf16.msra.mxu1 %v1252_v41  ;;  %v832_v43 = vld [vmem:[%s1766_s7 + $0x8] sm:$0xff] }
  0x2c   :  { %1149 = vmatmul.mubr.msk.f32.vlgmr.msra.gmra.mrb[0].mxu0 %vm41_vm0, %v360_v44  ;;  %v1607_v44 = vpack.c.bf16 %v832_v43, %v831_v42 }
  0x2d   :  { %1151 = vmatprep.mubr.msk.f32.mxu0 %vm41_vm0, %v361_v45 }
  0x2e   :  { %1257 = vmatprep.subr.bf16.mxu1 %v1607_v44 }
  0x30   :  { %1152 = vmatmul.mubr.msk.f32.gmra.mrb[2].mxu0 %vm41_vm0, %v362_v46 }
  0x31   :  { %1154 = vmatprep.mubr.msk.f32.mxu0 %vm41_vm0, %v363_v47 }
  0x34   :  { %1155 = vmatmul.mubr.msk.f32.gmra.mrb[4].mxu0 %vm41_vm0, %v364_v48 }
  0x35   :  { %1157 = vmatprep.mubr.msk.f32.mxu0 %vm41_vm0, %v365_v49 }
  0x38   :  { %1158 = vmatmul.mubr.msk.f32.gmra.mrb[6].mxu0 %vm41_vm0, %v366_v50 }
  0xff   :  { %v1150_v52 = vpop.f32.mrb[0].mxu0 }
 0x100   :  { %v1533_v53 = vadd.f32 %v1150_v52, %v999_v51  ;;  %v461_v54 = vpop.f32.mrb[1].mxu0 }
 0x101   :  { %v1535_v55 = vadd.f32 %v999_v51, %v461_v54 }
 0x102   :  { %v511_v56 = vsel %vm41_vm0, %v1533_v53, 0.0  ;;  %v542_v57 = vmul.f32 %v1533_v53, %v1533_v53 }
 0x103   :  { %512 = vadd.xlane.f32.xlu0 %v511_v56  ;;  %v1153_v58 = vpop.f32.mrb[2].mxu0  ;;  %v541_v61 = vmul.f32 %v1535_v55, %v1535_v55  ;;  %v508_v63 = vsel %vm41_vm0, %v1535_v55, 0.0 }
 0x104   :  { %v471_v59 = vpop.f32.mrb[3].mxu0  ;;  %v552_v60 = vsel %vm41_vm0, %v542_v57, 0.0  ;;  %v1548_v1 = vadd.f32 %v1153_v58, %v999_v51 }
 0x105   :  { %553 = vadd.xlane.f32.xlu1 %v552_v60  ;;  %v1544_v62 = vadd.f32 %v999_v51, %v471_v59  ;;  %v549_v3 = vsel %vm41_vm0, %v541_v61, 0.0 }
 0x106   :  { %v517_v10 = vsel %vm41_vm0, %v1548_v1, 0.0  ;;  %v544_v16 = vmul.f32 %v1548_v1, %v1548_v1 }
 0x107   :  { %509 = vadd.xlane.f32.xlu0 %v508_v63  ;;  %v1156_v0 = vpop.f32.mrb[4].mxu0  ;;  %v514_v4 = vsel %vm41_vm0, %v1544_v62, 0.0  ;;  %v543_v6 = vmul.f32 %v1544_v62, %v1544_v62 }
 0x108   :  { %v481_v2 = vpop.f32.mrb[5].mxu0  ;;  %v1562_v20 = vadd.f32 %v1156_v0, %v999_v51  ;;  %v558_v21 = vsel %vm41_vm0, %v544_v16, 0.0 }
 0x109   :  { %550 = vadd.xlane.f32.xlu1 %v549_v3  ;;  %v1559_v18 = vadd.f32 %v999_v51, %v481_v2  ;;  %v555_v19 = vsel %vm41_vm0, %v543_v6, 0.0 }
 0x10a   :  { %v523_v24 = vsel %vm41_vm0, %v1562_v20, 0.0  ;;  %v546_v25 = vmul.f32 %v1562_v20, %v1562_v20 }
 0x10b   :  { %515 = vadd.xlane.f32.xlu0 %v514_v4  ;;  %v1159_v8 = vpop.f32.mrb[6].mxu0  ;;  %v520_v22 = vsel %vm41_vm0, %v1559_v18, 0.0  ;;  %v545_v23 = vmul.f32 %v1559_v18, %v1559_v18 }
 0x10c   :  { %v491_v9 = vpop.f32.mrb[7].mxu0  ;;  %v1576_v28 = vadd.f32 %v1159_v8, %v999_v51  ;;  %v564_v29 = vsel %vm41_vm0, %v546_v25, 0.0 }
 0x10d   :  { %518 = vadd.xlane.f32.xlu1 %v517_v10  ;;  %v1573_v26 = vadd.f32 %v999_v51, %v491_v9  ;;  %v561_v27 = vsel %vm41_vm0, %v545_v23, 0.0 }
 0x10e   :  { %v529_v32 = vsel %vm41_vm0, %v1576_v28, 0.0  ;;  %v548_v33 = vmul.f32 %v1576_v28, %v1576_v28 }
 0x10f   :  { %556 = vadd.xlane.f32.xlu0 %v555_v19  ;;  %v526_v30 = vsel %vm41_vm0, %v1573_v26, 0.0  ;;  %v547_v31 = vmul.f32 %v1573_v26, %v1573_v26 }
 0x110   :  { %v570_v35 = vsel %vm41_vm0, %v548_v33, 0.0 }
 0x111   :  { %559 = vadd.xlane.f32.xlu1 %v558_v21  ;;  %v567_v34 = vsel %vm41_vm0, %v547_v31, 0.0 }
 0x113   :  { %521 = vadd.xlane.f32.xlu0 %v520_v22 }
 0x115   :  { %524 = vadd.xlane.f32.xlu1 %v523_v24 }
 0x117   :  { %562 = vadd.xlane.f32.xlu0 %v561_v27 }
 0x119   :  { %565 = vadd.xlane.f32.xlu1 %v564_v29 }
 0x11b   :  { %527 = vadd.xlane.f32.xlu0 %v526_v30 }
 0x11d   :  { %530 = vadd.xlane.f32.xlu1 %v529_v32 }
 0x11f   :  { %568 = vadd.xlane.f32.xlu0 %v567_v34 }
 0x121   :  { %571 = vadd.xlane.f32.xlu1 %v570_v35 }
 0x190   :  { %v513_v45 = vpop.xlane.xlu0 %512 }
 0x191   :  { %v534_v46 = vmul.f32 0.03125, %v513_v45 }
 0x192   :  { %v554_v47 = vpop.xlane.xlu1 %553 }
 0x193   :  { %v582_v48 = vmul.f32 %v534_v46, %v534_v46  ;;  %v574_v49 = vmul.f32 0.03125, %v554_v47  ;;  %v606_v31 = vsub.f32 %v1533_v53, %v534_v46 }
 0x194   :  { %v510_v50 = vpop.xlane.xlu0 %509 }
 0x195   :  { %v590_v51 = vsub.f32 %v574_v49, %v582_v48  ;;  %v533_v52 = vmul.f32 0.03125, %v510_v50 }
 0x196   :  { %v551_v54 = vpop.xlane.xlu1 %550 }
 0x197   :  { %v598_v56 = vmax.f32 %v590_v51, 0.0  ;;  %v581_v57 = vmul.f32 %v533_v52, %v533_v52  ;;  %v573_v58 = vmul.f32 0.03125, %v551_v54  ;;  %v605_v43 = vsub.f32 %v1535_v55, %v533_v52  ;;  %v1639_v51 = vld [vmem:[%s1763_s4] ss:$0 sm:$0xff] }
 0x198   :  { %v516_v59 = vpop.xlane.xlu0 %515 }
 0x199   :  { %v614_v60 = vadd.f32 1e-08, %v598_v56  ;;  %v589_v61 = vsub.f32 %v573_v58, %v581_v57  ;;  %v1610_v63 = vmul.f32 0.03125, %v516_v59 }
 0x19a   :  { %v519_v0 = vpop.xlane.xlu1 %518 }
 0x19b   :  { %1316 = vrsqrt.f32 %v614_v60  ;;  %v597_v2 = vmax.f32 %v589_v61, 0.0  ;;  %v1612_v3 = vmul.f32 0.03125, %v519_v0  ;;  %v583_v8 = vmul.f32 %v1610_v63, %v1610_v63 }
 0x19c   :  { %v557_v4 = vpop.xlane.xlu0 %556 }
 0x19d   :  { %v613_v6 = vadd.f32 1e-08, %v597_v2  ;;  %v575_v9 = vmul.f32 0.03125, %v557_v4  ;;  %v584_v16 = vmul.f32 %v1612_v3, %v1612_v3  ;;  %v607_v4 = vsub.f32 %v1544_v62, %v1610_v63 }
 0x19e   :  { %v560_v10 = vpop.xlane.xlu1 %559  ;;  %v608_v62 = vsub.f32 %v1548_v1, %v1612_v3  ;;  %v836_v1 = vld [vmem:[%s1766_s7 + $0x28] sm:$0xff] }
 0x19f   :  { %1318 = vrsqrt.f32 %v613_v6  ;;  %v591_v19 = vsub.f32 %v575_v9, %v583_v8  ;;  %v576_v21 = vmul.f32 0.03125, %v560_v10  ;;  %v833_v9 = vld [vmem:[%s1766_s7 + $0x10] sm:$0xff]  ;;  %v834_v10 = vld [vmem:[%s1766_s7 + $0x18] sm:$0xff] }
 0x1a0   :  { %v522_v22 = vpop.xlane.xlu0 %521 }
 0x1a1   :  { %v599_v23 = vmax.f32 %v591_v19, 0.0  ;;  %v592_v24 = vsub.f32 %v576_v21, %v584_v16  ;;  %v1618_v25 = vmul.f32 0.03125, %v522_v22 }
 0x1a2   :  { %v525_v27 = vpop.xlane.xlu1 %524 }
 0x1a3   :  { %v615_v29 = vadd.f32 1e-08, %v599_v23  ;;  %v600_v30 = vmax.f32 %v592_v24, 0.0  ;;  %v1621_v32 = vmul.f32 0.03125, %v525_v27  ;;  %v585_v36 = vmul.f32 %v1618_v25, %v1618_v25 }
 0x1a4   :  { %v563_v33 = vpop.xlane.xlu0 %562 }
 0x1a5   :  { %v1317_v34 = vpop.eup %1316  ;;  %1320 = vrsqrt.f32 %v615_v29  ;;  %v616_v35 = vadd.f32 1e-08, %v600_v30  ;;  %v577_v37 = vmul.f32 0.03125, %v563_v33  ;;  %v586_v53 = vmul.f32 %v1621_v32, %v1621_v32 }
 0x1a6   :  { %v566_v39 = vpop.xlane.xlu1 %565  ;;  %v630_v40 = vmul.f32 %v1317_v34, %v606_v31  ;;  %v1260_v31 = vpack.c.bf16 %v834_v10, %v833_v9 }
 0x1a7   :  { %1322 = vrsqrt.f32 %v616_v35  ;;  %v593_v41 = vsub.f32 %v577_v37, %v585_v36  ;;  %v578_v42 = vmul.f32 0.03125, %v566_v39  ;;  %v835_v35 = vld [vmem:[%s1766_s7 + $0x20] sm:$0xff] }
 0x1a8   :  { %v528_v45 = vpop.xlane.xlu0 %527  ;;  %v645_v46 = vmul.f32 %v1628_v38, %v630_v40 }
 0x1a9   :  { %v1319_v47 = vpop.eup %1318  ;;  %v601_v48 = vmax.f32 %v593_v41, 0.0  ;;  %v594_v49 = vsub.f32 %v578_v42, %v586_v53  ;;  %v1634_v50 = vmul.f32 0.03125, %v528_v45  ;;  %v1264_v53 = vpack.c.bf16 %v836_v1, %v835_v35  ;;  %v837_v45 = vld [vmem:[%s1766_s7 + $0x30] sm:$0xff] }
 0x1aa   :  { %v531_v54 = vpop.xlane.xlu1 %530  ;;  %v629_v56 = vmul.f32 %v1319_v47, %v605_v43  ;;  %v660_v60 = vadd.f32 %v1639_v51, %v645_v46  ;;  %v609_v41 = vsub.f32 %v1559_v18, %v1618_v25  ;;  %v838_v46 = vld [vmem:[%s1766_s7 + $0x38] sm:$0xff] }
 0x1ab   :  { %v617_v57 = vadd.f32 1e-08, %v601_v48  ;;  %v602_v58 = vmax.f32 %v594_v49, 0.0  ;;  %v1641_v59 = vmul.f32 0.03125, %v531_v54  ;;  %v587_v0 = vmul.f32 %v1634_v50, %v1634_v50 }
 0x1ac   :  { %v569_v55 = vpop.xlane.xlu0 %568  ;;  %v644_v52 = vmul.f32 %v1628_v38, %v629_v56  ;;  %v668_v30 = vmax.f32 %v660_v60, 0.0  ;;  %v1268_v49 = vpack.c.bf16 %v838_v46, %v837_v45 }
 0x1ad   :  { %1324 = vrsqrt.f32 %v617_v57  ;;  %v618_v61 = vadd.f32 1e-08, %v602_v58  ;;  %v579_v2 = vmul.f32 0.03125, %v569_v55  ;;  %v588_v19 = vmul.f32 %v1641_v59, %v1641_v59  ;;  %v839_v57 = vld [vmem:[%s1766_s7 + $0x40] sm:$0xff] }
 0x1ae   :  { %v572_v6 = vpop.xlane.xlu1 %571  ;;  %v659_v8 = vadd.f32 %v1639_v51, %v644_v52  ;;  %v611_v52 = vsub.f32 %v1573_v26, %v1634_v50 }
 0x1af   :  { %v1321_v16 = vpop.eup %1320  ;;  %1326 = vrsqrt.f32 %v618_v61  ;;  %v595_v21 = vsub.f32 %v579_v2, %v587_v0  ;;  %v580_v22 = vmul.f32 0.03125, %v572_v6  ;;  %v841_v0 = vld [vmem:[%s1766_s7 + $0x50] sm:$0xff]  ;;  %v842_v2 = vld [vmem:[%s1766_s7 + $0x58] sm:$0xff]  ;;  %v612_v6 = vsub.f32 %v1576_v28, %v1641_v59 }
 0x1b0   :  { %v667_v63 = vmax.f32 %v659_v8, 0.0  ;;  %v631_v23 = vmul.f32 %v1321_v16, %v607_v4  ;;  %v1276_v50 = vpack.c.bf16 %v842_v2, %v841_v0 }
 0x1b1   :  { %v1323_v24 = vpop.eup %1322  ;;  %v603_v27 = vmax.f32 %v595_v21, 0.0  ;;  %v596_v29 = vsub.f32 %v580_v22, %v588_v19 }
 0x1b2   :  { %1168 = vmatprep.mubr.msk.f32.mxu1 %vm41_vm0, %v667_v63  ;;  %v646_v33 = vmul.f32 %v1628_v38, %v631_v23  ;;  %v632_v34 = vmul.f32 %v1323_v24, %v608_v62  ;;  %v843_v62 = vld [vmem:[%s1766_s7 + $0x60] sm:$0xff]  ;;  %v844_v63 = vld [vmem:[%s1766_s7 + $0x68] sm:$0xff]  ;;  %v846_v23 = vld [vmem:[%s1766_s7 + $0x78] sm:$0xff] }
 0x1b3   :  { %v619_v3 = vadd.f32 1e-08, %v603_v27  ;;  %v604_v36 = vmax.f32 %v596_v29, 0.0  ;;  %1169 = vmatmul.mubr.msk.f32.vlgmr.msra.gmra.mrb[0].mxu1 %vm41_vm0, %v668_v30  ;;  %v1018_v27 = vld [vmem:[%s1765_s6] ss:$0 sm:$0xff] }
 0x1b4   :  { %v661_v37 = vadd.f32 %v1639_v51, %v646_v33  ;;  %v647_v39 = vmul.f32 %v1628_v38, %v632_v34  ;;  %1259 = vmatpush3.bf16.msra.mxu1 %v1607_v44  ;;  %v610_v44 = vsub.f32 %v1562_v20, %v1621_v32  ;;  %v840_v20 = vld [vmem:[%s1766_s7 + $0x48] sm:$0xff] }
 0x1b5   :  { %1328 = vrsqrt.f32 %v619_v3  ;;  %v620_v40 = vadd.f32 1e-08, %v604_v36  ;;  %1261 = vmatprep.subr.bf16.mxu1 %v1260_v31  ;;  %v1272_v55 = vpack.c.bf16 %v840_v20, %v839_v57 }
 0x1b6   :  { %v669_v42 = vmax.f32 %v661_v37, 0.0  ;;  %v662_v43 = vadd.f32 %v1639_v51, %v647_v39 }
 0x1b7   :  { %v1325_v47 = vpop.eup %1324  ;;  %1330 = vrsqrt.f32 %v620_v40 }
 0x1b8   :  { %1171 = vmatprep.mubr.msk.f32.mxu1 %vm41_vm0, %v669_v42  ;;  %v670_v48 = vmax.f32 %v662_v43, 0.0  ;;  %v633_v18 = vmul.f32 %v1325_v47, %v609_v41  ;;  %1263 = vmatpush3.bf16.msra.mxu1 %v1260_v31 }
 0x1b9   :  { %v1327_v25 = vpop.eup %1326  ;;  %1265 = vmatprep.subr.bf16.mxu1 %v1264_v53 }
 0x1ba   :  { %1172 = vmatmul.mubr.msk.f32.gmra.mrb[2].mxu1 %vm41_vm0, %v670_v48  ;;  %v648_v54 = vmul.f32 %v1628_v38, %v633_v18  ;;  %v634_v56 = vmul.f32 %v1327_v25, %v610_v44 }
 0x1bc   :  { %v663_v32 = vadd.f32 %v1639_v51, %v648_v54  ;;  %v649_v58 = vmul.f32 %v1628_v38, %v634_v56  ;;  %1267 = vmatpush3.bf16.msra.mxu1 %v1264_v53 }
 0x1bd   :  { %1269 = vmatprep.subr.bf16.mxu1 %v1268_v49 }
 0x1be   :  { %v671_v60 = vmax.f32 %v663_v32, 0.0  ;;  %v664_v61 = vadd.f32 %v1639_v51, %v649_v58 }
 0x1bf   :  { %v1329_v4 = vpop.eup %1328 }
 0x1c0   :  { %1174 = vmatprep.mubr.msk.f32.mxu1 %vm41_vm0, %v671_v60  ;;  %v672_v8 = vmax.f32 %v664_v61, 0.0  ;;  %v635_v9 = vmul.f32 %v1329_v4, %v611_v52  ;;  %1271 = vmatpush3.bf16.msra.mxu1 %v1268_v49  ;;  %v1027_v60 = vld [vmem:[%s1767_s8] ss:$0 sm:$0xff]  ;;  %s1357_s8 = smov [#allocation3]  }
 0x1c1   :  { %v1331_v26 = vpop.eup %1330  ;;  %1273 = vmatprep.subr.bf16.mxu1 %v1272_v55  ;;  %s980_s21 = sshll.u32 %s1357_s8, 4  ;;  %s981_s21 = int_to_ptr.vmem [resolvable:$true] %s980_s21 }
 0x1c2   :  { %1175 = vmatmul.mubr.msk.f32.gmra.mrb[4].mxu1 %vm41_vm0, %v672_v8  ;;  %v650_v10 = vmul.f32 %v1628_v38, %v635_v9  ;;  %v636_v16 = vmul.f32 %v1331_v26, %v612_v6  ;;  %s1332_s22 = scalar_lea.vmem %s981_s21, 1024  ;;  %p1337_p1 = scmp.lt.s32.totalorder %s981_s21, %s981_s21 }
 0x1c3   :  { %p1333_p0 = scmp.ne.s32.totalorder %s981_s21, %s1332_s22  ;;  %p1338_p2 = scmp.lt.s32.totalorder %s1332_s22, %s1332_s22 }
 0x1c4   :  { %v665_v19 = vadd.f32 %v1639_v51, %v650_v10  ;;  %v651_v21 = vmul.f32 %v1628_v38, %v636_v16  ;;  %1275 = vmatpush3.bf16.msra.mxu1 %v1272_v55  ;;  %v1280_v38 = vpack.c.bf16 %v844_v63, %v843_v62 }
 0x1c5   :  { %1277 = vmatprep.subr.bf16.mxu1 %v1276_v50  ;;  %p1339_p3 = por %p1338_p2, %p1337_p1 }
 0x1c6   :  { %v673_v28 = vmax.f32 %v665_v19, 0.0  ;;  %v666_v59 = vadd.f32 %v1639_v51, %v651_v21  ;;  %v845_v51 = vld [vmem:[%s1766_s7 + $0x70] sm:$0xff] }
 0x1c7   :  { %v1284_v24 = vpack.c.bf16 %v846_v23, %v845_v51  ;;  %p1340_p4 = pnand %p1339_p3, %p1333_p0 }
 0x1c8   :  { %1177 = vmatprep.mubr.msk.f32.mxu1 %vm41_vm0, %v673_v28  ;;  %v674_v22 = vmax.f32 %v666_v59, 0.0  ;;  %1279 = vmatpush3.bf16.msra.mxu1 %v1276_v50 }
 0x1c9   :  { %1281 = vmatprep.subr.bf16.mxu1 %v1280_v38 }
 0x1ca   :  { %1178 = vmatmul.mubr.msk.f32.gmra.mrb[6].mxu1 %vm41_vm0, %v674_v22 }
 0x1cc   :  { %1283 = vmatpush3.bf16.msra.mxu1 %v1280_v38 }
 0x1cd   :  { %1285 = vmatprep.subr.bf16.mxu1 %v1284_v24 }
 0x1d0   :  { %1287 = vmatpush3.bf16.msra.mxu1 %v1284_v24 }
 0x286   :  { %v1170_v29 = vpop.f32.mrb[0].mxu1 }
 0x287   :  { %v782_v30 = vadd.f32 %v1170_v29, %v1018_v27  ;;  %v776_v31 = vpop.f32.mrb[1].mxu1 }
 0x288   :  { %v777_v33 = vadd.f32 %v1018_v27, %v776_v31 }
 0x289   :  { %v816_v34 = vmul.f32 0.01, %v782_v30 }
 0x28a   :  { %v815_v35 = vmul.f32 0.01, %v777_v33 }
 0x28b   :  { %v824_v3 = vmax.f32 %v782_v30, %v816_v34 }
 0x28c   :  { %v823_v1 = vmax.f32 %v777_v33, %v815_v35 }
 0x28d   :  { %v1173_v36 = vpop.f32.mrb[2].mxu1 }
 0x28e   :  { %v792_v37 = vadd.f32 %v1173_v36, %v1018_v27  ;;  %v786_v39 = vpop.f32.mrb[3].mxu1  ;;  %1212 = vmatprep.mubr.f32.mxu1 %v823_v1 }
 0x28f   :  { %v787_v40 = vadd.f32 %v1018_v27, %v786_v39  ;;  %1213 = vmatmul.mubr.f32.vlgmr.msra.gmra.mrb[8].mxu1 %v824_v3 }
 0x290   :  { %v818_v53 = vmul.f32 0.01, %v792_v37 }
 0x291   :  { %v817_v41 = vmul.f32 0.01, %v787_v40 }
 0x292   :  { %v826_v43 = vmax.f32 %v792_v37, %v818_v53 }
 0x293   :  { %v825_v42 = vmax.f32 %v787_v40, %v817_v41 }
 0x295   :  { %v1176_v45 = vpop.f32.mrb[4].mxu1  ;;  %1215 = vmatprep.mubr.f32.mxu1 %v825_v42 }
 0x296   :  { %v802_v46 = vadd.f32 %v1176_v45, %v1018_v27  ;;  %v796_v47 = vpop.f32.mrb[5].mxu1  ;;  %1216 = vmatmul.mubr.f32.gmra.mrb[10].mxu1 %v826_v43 }
 0x297   :  { %v797_v44 = vadd.f32 %v1018_v27, %v796_v47 }
 0x298   :  { %v820_v48 = vmul.f32 0.01, %v802_v46 }
 0x299   :  { %v819_v18 = vmul.f32 0.01, %v797_v44 }
 0x29a   :  { %v828_v49 = vmax.f32 %v802_v46, %v820_v48 }
 0x29b   :  { %v827_v25 = vmax.f32 %v797_v44, %v819_v18 }
 0x29d   :  { %v1179_v54 = vpop.f32.mrb[6].mxu1  ;;  %1218 = vmatprep.mubr.f32.mxu1 %v827_v25 }
 0x29e   :  { %v812_v56 = vadd.f32 %v1179_v54, %v1018_v27  ;;  %v806_v57 = vpop.f32.mrb[7].mxu1  ;;  %1219 = vmatmul.mubr.f32.gmra.mrb[12].mxu1 %v828_v49 }
 0x29f   :  { %v807_v20 = vadd.f32 %v1018_v27, %v806_v57 }
 0x2a0   :  { %v822_v32 = vmul.f32 0.01, %v812_v56 }
 0x2a1   :  { %v821_v58 = vmul.f32 0.01, %v807_v20 }
 0x2a2   :  { %v830_v52 = vmax.f32 %v812_v56, %v822_v32 }
 0x2a3   :  { %v829_v55 = vmax.f32 %v807_v20, %v821_v58 }
 0x2a5   :  { %1221 = vmatprep.mubr.f32.mxu1 %v829_v55 }
 0x2a6   :  { %1222 = vmatmul.mubr.f32.gmra.mrb[14].mxu1 %v830_v52 }
 0x362   :  { %v1214_v61 = vpop.f32.mrb[8].mxu1 }
 0x363   :  { %v926_v0 = vadd.f32 %v1214_v61, %v1027_v60  ;;  %v920_v2 = vpop.f32.mrb[9].mxu1 }
 0x364   :  { %v921_v4 = vadd.f32 %v1027_v60, %v920_v2 }
 0x365   :  { %v960_v6 = vadd.f32 %v926_v0, %v1434_v7 }
 0x366   :  { %v959_v8 = vadd.f32 %v921_v4, %v1425_v5 }
 0x367   :  { %968 = vst.msk [vmem:[#allocation3 + $0x8] sm:$0xff] %vm41_vm0, %v960_v6 }
 0x368   :  { %967 = vst.msk [vmem:[#allocation3] sm:$0xff] %vm41_vm0, %v959_v8 }
 0x369   :  { %v1217_v9 = vpop.f32.mrb[10].mxu1 }
 0x36a   :  { %v936_v26 = vadd.f32 %v1217_v9, %v1027_v60  ;;  %v930_v50 = vpop.f32.mrb[11].mxu1 }
 0x36b   :  { %v931_v10 = vadd.f32 %v1027_v60, %v930_v50 }
 0x36c   :  { %v962_v16 = vadd.f32 %v936_v26, %v1456_v12 }
 0x36d   :  { %v961_v19 = vadd.f32 %v931_v10, %v1449_v11 }
 0x36e   :  { %970 = vst.msk [vmem:[#allocation3 + $0x18] sm:$0xff] %vm41_vm0, %v962_v16 }
 0x36f   :  { %969 = vst.msk [vmem:[#allocation3 + $0x10] sm:$0xff] %vm41_vm0, %v961_v19 }
 0x371   :  { %v1220_v21 = vpop.f32.mrb[12].mxu1 }
 0x372   :  { %v946_v7 = vadd.f32 %v1220_v21, %v1027_v60  ;;  %v940_v28 = vpop.f32.mrb[13].mxu1 }
 0x373   :  { %v941_v5 = vadd.f32 %v1027_v60, %v940_v28 }
 0x374   :  { %v964_v59 = vadd.f32 %v946_v7, %v1466_v14 }
 0x375   :  { %v963_v22 = vadd.f32 %v941_v5, %v1461_v13 }
 0x376   :  { %972 = vst.msk [vmem:[#allocation3 + $0x28] sm:$0xff] %vm41_vm0, %v964_v59 }
 0x377   :  { %971 = vst.msk [vmem:[#allocation3 + $0x20] sm:$0xff] %vm41_vm0, %v963_v22 }
 0x379   :  { %v1223_v62 = vpop.f32.mrb[14].mxu1 }
 0x37a   :  { %v956_v12 = vadd.f32 %v1223_v62, %v1027_v60  ;;  %v950_v63 = vpop.f32.mrb[15].mxu1 }
 0x37b   :  { %v951_v11 = vadd.f32 %v1027_v60, %v950_v63 }
 0x37c   :  { %v966_v38 = vadd.f32 %v956_v12, %v1484_v17 }
 0x37d   :  { %v965_v51 = vadd.f32 %v951_v11, %v1477_v15 }
 0x37e   :  { %974 = vst.msk [vmem:[#allocation3 + $0x38] sm:$0xff] %vm41_vm0, %v966_v38 }
 0x37f   :  { %973 = vst.msk [vmem:[#allocation3 + $0x30] sm:$0xff] %vm41_vm0, %v965_v51 }
 0x380   :  { %1343 = shalt.err (!%p1340_p4)
}
 0x381   :  { %s1344_s25 = scalar_lea.hbm %s1768_s9, 1024 }
 0x382   :  { %p1345_p5 = scmp.ne.s32.totalorder %s1768_s9, %s1344_s25  ;;  %p1348_p6 = scmp.lt.u32.totalorder %s1344_s25, %s1768_s9 }
 0x384   :  { %p1350_p7 = pnand %p1348_p6, %p1345_p5 }
 0x386   :  { %1353 = shalt.err (!%p1350_p7)
}
 0x387   :  { %s1358_s28 = smov 128   ;;  %s1359_s29 = smov 8  }
 0x388   :  { %986 = dma.vmem_to_hbm [thread:$0]  %s981_s21, 1024, %s1768_s9, [#allocation4], %s1358_s28, %s1358_s28, %s1359_s29  }
 0x389   :  { %1354 = dma.done.wait [#allocation4], 1024  }
 0x38a   :  { %1355 = vsyncadd [#allocation4], 4294966272 }
 0x38b   :  { %990 = vsyncpa [#allocation4], 1 }

</bundles_post_ra>
